<compile_context>
chip_gen: v6e
topology: v6e:2x2x1
jax: 0.10.0
libtpu: 0.0.40
codegen_flags: <defaults>
</compile_context>

<pallas_src>
import functools

import jax
import jax.numpy as jnp
from jax.experimental import pallas as pl
from jax.experimental.pallas import tpu as pltpu


def _round_up(x: int, m: int) -> int:
    return ((x + m - 1) // m) * m


def _cdiv(a: int, b: int) -> int:
    return (a + b - 1) // b


# ----------------------------------------------------------------------------
# Kernel
# ----------------------------------------------------------------------------
def adapter_kernel(x_ref, w1_ref, b1_ref, w2_ref, b2_ref, o_ref, acc_ref,
                   *, seq_len: int, ts: int):
    # x_ref:  (TB, TS, D)   current batch/sequence tile
    # w1_ref: (D, H)  b1_ref: (1, H)
    # w2_ref: (H, Lp) b2_ref: (1, Lp)
    # o_ref:  (TB, Lp)
    # acc_ref:(TB, D) f32 running sequence sum (persists across the S axis)
    s = pl.program_id(1)
    last = pl.num_programs(1) - 1

    @pl.when(s == 0)
    def _init():
        acc_ref[...] = jnp.zeros_like(acc_ref)

    if seq_len % ts != 0:
        # Partial last sequence tile exists: pay the mask only on that step.
        @pl.when(s != last)
        def _accum_full():
            acc_ref[...] += jnp.sum(x_ref[...].astype(jnp.float32), axis=1)

        @pl.when(s == last)
        def _accum_tail():
            x = x_ref[...].astype(jnp.float32)
            seq_ids = jax.lax.broadcasted_iota(jnp.int32, (1, ts, 1), 1) + s * ts
            x = jnp.where(seq_ids < seq_len, x, 0.0)
            acc_ref[...] += jnp.sum(x, axis=1)
    else:
        acc_ref[...] += jnp.sum(x_ref[...].astype(jnp.float32), axis=1)

    @pl.when(s == last)
    def _finalize():
        pooled = acc_ref[...] * (1.0 / float(seq_len))       # exact mean over S
        h = jnp.dot(pooled, w1_ref[...],
                    preferred_element_type=jnp.float32) + b1_ref[...]
        h = jnp.maximum(h, 0.0)                               # ReLU
        logits = jnp.dot(h, w2_ref[...],
                         preferred_element_type=jnp.float32) + b2_ref[...]
        o_ref[...] = logits.astype(o_ref.dtype)


# ----------------------------------------------------------------------------
# Wrapper
# ----------------------------------------------------------------------------
def _vmem_limit_bytes() -> int:
    """Generation-aware scoped-VMEM request (v5e/v6e: ~96 MiB, v7x: ~48 MiB)."""
    try:
        cap = int(pltpu.get_tpu_info().vmem_capacity_bytes)
    except Exception:
        cap = 64 * 1024 * 1024  # conservative (v7x-sized) fallback
    return max(16 * 1024 * 1024, (cap * 3) // 4)


def _choose_tiles(B, S, D, itemsize, H, Lp, vmem_limit):
    """Pick (TB, TS) so 2*TB*TS*D*itemsize (+ residents) fits the VMEM budget."""
    align = {4: 8, 2: 16, 1: 32}.get(itemsize, 8)   # sublane packing per dtype
    if B <= 8:
        tb = B                                       # full-extent batch block
    else:
        # aim for >=2 batch tiles (keeps both v7x TensorCores busy), mult of 8
        tb = min(128, _round_up(_cdiv(B, 2), 8))

    # TODO(synk): weights could be single-buffered via pipeline_mode=pl.Buffered(1);
    # here they are conservatively budgeted as double-buffered instead.
    while True:
        resident = 2 * 4 * (D * H + H + H * Lp + Lp)   # weights+biases, 2 bufs
        resident += 4 * tb * D                          # f32 accumulator scratch
        resident += 2 * 4 * tb * Lp                     # output block, 2 bufs
        x_budget = vmem_limit - resident - (2 << 20)    # 2 MiB headroom
        ts_fit = x_budget // (2 * tb * D * itemsize) if x_budget > 0 else 0
        if ts_fit >= S:
            return tb, S                                # full-extent seq block
        if ts_fit >= align:
            return tb, int((ts_fit // align) * align)
        if tb > 8:                                      # shrink TB before TS
            tb = max(8, _round_up(tb // 2, 8))
            continue
        return tb, align                                # best effort (huge D)


def adapter_forward(x, w1, b1, w2, b2, *, max_seq_tile=None):
    """x: (B, S, D) f32/bf16. w1: (D, H), b1: (1, H), w2: (H, L), b2: (1, L).
    Returns (B, L) float32 == fc2(relu(fc1(mean(x, axis=1))))."""
    B, S, D = x.shape
    H = w1.shape[1]
    L = w2.shape[1]

    # --- lane-dense output: pad num_labels to a multiple of 128 -------------
    Lp = _round_up(L, 128)
    if Lp != L:
        w2 = jnp.pad(w2, ((0, 0), (0, Lp - L)))
        b2 = jnp.pad(b2, ((0, 0), (0, Lp - L)))

    vmem_limit = _vmem_limit_bytes()
    itemsize = x.dtype.itemsize
    TB, TS = _choose_tiles(B, S, D, itemsize, H, Lp, vmem_limit)
    if max_seq_tile is not None:  # test hook to force the multi-step/tail path
        align = {4: 8, 2: 16, 1: 32}.get(itemsize, 8)
        TS = max(align, (min(TS, max_seq_tile) // align) * align)

    grid = (_cdiv(B, TB), _cdiv(S, TS))

    kernel = functools.partial(adapter_kernel, seq_len=S, ts=TS)

    cost = pl.CostEstimate(
        flops=int(2 * B * (D * H + H * Lp) + B * S * D),
        transcendentals=0,
        bytes_accessed=int(B * S * D * itemsize
                           + 4 * (D * H + H + H * Lp + Lp)
                           + 4 * B * Lp),
    )

    out_padded = pl.pallas_call(
        kernel,
        out_shape=jax.ShapeDtypeStruct((B, Lp), jnp.float32),
        grid_spec=pltpu.PrefetchScalarGridSpec(
            num_scalar_prefetch=0,
            grid=grid,
            in_specs=[
                # x streamed in (TB, TS, D) tiles, pipelined over (b, s).
                pl.BlockSpec((TB, TS, D), lambda b, s: (b, s, 0)),
                # Weights / biases: constant index_map -> stay VMEM-resident.
                pl.BlockSpec((D, H), lambda b, s: (0, 0)),
                pl.BlockSpec((1, H), lambda b, s: (0, 0)),
                pl.BlockSpec((H, Lp), lambda b, s: (0, 0)),
                pl.BlockSpec((1, Lp), lambda b, s: (0, 0)),
            ],
            # Output block invariant along the S axis (accumulator pattern).
            out_specs=pl.BlockSpec((TB, Lp), lambda b, s: (b, 0)),
            scratch_shapes=[pltpu.VMEM((TB, D), jnp.float32)],
        ),
        compiler_params=pltpu.CompilerParams(
            # Batch axis parallel (sharded across TCs on v7x); S is reduction.
            dimension_semantics=("parallel", "arbitrary"),
            vmem_limit_bytes=int(vmem_limit),
        ),
        cost_estimate=cost,
    )(x, w1, b1, w2, b2)

    return out_padded[:, :L] if Lp != L else out_padded


# ----------------------------------------------------------------------------
# Params + test
# ----------------------------------------------------------------------------
def init_params(key, input_dim, num_labels, hidden=256):
    """Deterministic init mimicking nn.Linear's uniform(-1/sqrt(fan_in), ...)."""
    k1, k2, k3, k4 = jax.random.split(key, 4)
    lim1 = 1.0 / jnp.sqrt(jnp.float32(input_dim))
    lim2 = 1.0 / jnp.sqrt(jnp.float32(hidden))
    # stored as (in, out) == transpose of PyTorch's (out, in) weight
    w1 = jax.random.uniform(k1, (input_dim, hidden), jnp.float32, -lim1, lim1)
    b1 = jax.random.uniform(k2, (1, hidden), jnp.float32, -lim1, lim1)
    w2 = jax.random.uniform(k3, (hidden, num_labels), jnp.float32, -lim2, lim2)
    b2 = jax.random.uniform(k4, (1, num_labels), jnp.float32, -lim2, lim2)
    return w1, b1, w2, b2


def _ref(x, w1, b1, w2, b2):
    pooled = jnp.mean(x.astype(jnp.float32), axis=1)
    return jnp.maximum(pooled @ w1 + b1, 0.0) @ w2 + b2


if __name__ == "__main__":
    key = jax.random.PRNGKey(0)
    kx, kp, kx2 = jax.random.split(key, 3)

    # Small shapes consistent with the module: batch=2, seq=8, input_dim=32.
    B, S, D = 2, 8, 32
    num_labels = 4

    x = jax.random.normal(kx, (B, S, D), dtype=jnp.float32)
    w1, b1, w2, b2 = init_params(kp, D, num_labels)

    out = adapter_forward(x, w1, b1, w2, b2)
    out = jax.block_until_ready(out)
    assert out.shape == (B, num_labels)
    assert jnp.allclose(out, _ref(x, w1, b1, w2, b2), atol=1e-5, rtol=1e-5)

    # Second check: non-divisible sequence length with a forced small seq tile
    # to exercise the multi-step accumulator and the masked-tail path.
    S2 = 20
    x2 = jax.random.normal(kx2, (B, S2, D), dtype=jnp.float32)
    out2 = adapter_forward(x2, w1, b1, w2, b2, max_seq_tile=8)
    out2 = jax.block_until_ready(out2)
    assert out2.shape == (B, num_labels)
    assert jnp.allclose(out2, _ref(x2, w1, b1, w2, b2), atol=1e-5, rtol=1e-5)

    print("KERNEL_OK")
</pallas_src>

<mosaic_0001>
module attributes {stable_mosaic.version = 11 : i64} {
  func.func @adapter_kernel(%arg0: i32, %arg1: i32, %arg2: memref<2x8x32xf32, #tpu.memory_space<vmem>>, %arg3: memref<32x256xf32, #tpu.memory_space<vmem>>, %arg4: memref<1x256xf32, #tpu.memory_space<vmem>>, %arg5: memref<256x128xf32, #tpu.memory_space<vmem>>, %arg6: memref<1x128xf32, #tpu.memory_space<vmem>>, %arg7: memref<2x128xf32, #tpu.memory_space<vmem>>, %arg8: memref<2x32xf32, #tpu.memory_space<vmem>>) attributes {dimension_semantics = [#tpu.dimension_semantics<parallel>, #tpu.dimension_semantics<arbitrary>], iteration_bounds = array<i64: 1, 1>, scalar_prefetch = 0 : i64, scratch_operands = 1 : i64, tpu.core_type = #tpu.core_type<tc>, window_params = [{transform_indices = @transform_0, window_bounds = array<i64: 2, 8, 32>}, {pipeline_mode = #tpu.pipeline_mode<synchronous>, transform_indices = @transform_1, window_bounds = array<i64: 32, 256>}, {pipeline_mode = #tpu.pipeline_mode<synchronous>, transform_indices = @transform_2, window_bounds = array<i64: 1, 256>}, {pipeline_mode = #tpu.pipeline_mode<synchronous>, transform_indices = @transform_3, window_bounds = array<i64: 256, 128>}, {pipeline_mode = #tpu.pipeline_mode<synchronous>, transform_indices = @transform_4, window_bounds = array<i64: 1, 128>}, {transform_indices = @transform_5, window_bounds = array<i64: 2, 128>}]} {
    %c0_i32 = arith.constant 0 : i32
    %0 = arith.cmpi eq, %arg1, %c0_i32 : i32
    %1 = arith.extui %0 : i1 to i32
    %c0_i32_0 = arith.constant 0 : i32
    %2 = arith.cmpi ne, %1, %c0_i32_0 : i32
    scf.if %2 {
      %cst_9 = arith.constant 0.000000e+00 : f32
      %11 = vector.broadcast %cst_9 : f32 to vector<2x32xf32>
      %c0_10 = arith.constant 0 : index
      %c0_11 = arith.constant 0 : index
      %12 = vector.load %arg8[%c0_10, %c0_11] : memref<2x32xf32, #tpu.memory_space<vmem>>, vector<2x32xf32>
      tpu.vector_store %arg8[%c0_10, %c0_11], %11 {strides = array<i32>} : memref<2x32xf32, #tpu.memory_space<vmem>>, vector<2x32xf32>,
    } else {
    }
    %c0 = arith.constant 0 : index
    %c0_1 = arith.constant 0 : index
    %3 = vector.load %arg8[%c0, %c0_1] : memref<2x32xf32, #tpu.memory_space<vmem>>, vector<2x32xf32>
    %c0_2 = arith.constant 0 : index
    %c0_3 = arith.constant 0 : index
    %c0_4 = arith.constant 0 : index
    %4 = vector.load %arg2[%c0_2, %c0_3, %c0_4] : memref<2x8x32xf32, #tpu.memory_space<vmem>>, vector<2x8x32xf32>
    %cst = arith.constant dense<0.000000e+00> : vector<2x32xf32>
    %5 = vector.multi_reduction <add>, %4, %cst [1] : vector<2x8x32xf32> to vector<2x32xf32>
    %6 = arith.addf %3, %5 : vector<2x32xf32>
    %c0_5 = arith.constant 0 : index
    %c0_6 = arith.constant 0 : index
    %7 = vector.load %arg8[%c0_5, %c0_6] : memref<2x32xf32, #tpu.memory_space<vmem>>, vector<2x32xf32>
    tpu.vector_store %arg8[%c0_5, %c0_6], %6 {strides = array<i32>} : memref<2x32xf32, #tpu.memory_space<vmem>>, vector<2x32xf32>,
    %c0_i32_7 = arith.constant 0 : i32
    %8 = arith.cmpi eq, %arg1, %c0_i32_7 : i32
    %9 = arith.extui %8 : i1 to i32
    %c0_i32_8 = arith.constant 0 : i32
    %10 = arith.cmpi ne, %9, %c0_i32_8 : i32
    scf.if %10 {
      %c0_9 = arith.constant 0 : index
      %c0_10 = arith.constant 0 : index
      %11 = vector.load %arg8[%c0_9, %c0_10] : memref<2x32xf32, #tpu.memory_space<vmem>>, vector<2x32xf32>
      %cst_11 = arith.constant 1.250000e-01 : f32
      %12 = vector.broadcast %cst_11 : f32 to vector<2x32xf32>
      %13 = arith.mulf %11, %12 : vector<2x32xf32>
      %c0_12 = arith.constant 0 : index
      %c0_13 = arith.constant 0 : index
      %14 = vector.load %arg3[%c0_12, %c0_13] : memref<32x256xf32, #tpu.memory_space<vmem>>, vector<32x256xf32>
      %cst_14 = arith.constant dense<0.000000e+00> : vector<2x256xf32>
      %15 = tpu.matmul %13, %14, %cst_14 {dimension_numbers = #tpu.dot_dimension_numbers<[1], [0], [0], [1], [0, 0, 1, 1], [], []>} : vector<2x32xf32>, vector<32x256xf32>, vector<2x256xf32> -> vector<2x256xf32>
      %c0_15 = arith.constant 0 : index
      %c0_16 = arith.constant 0 : index
      %16 = vector.load %arg4[%c0_15, %c0_16] : memref<1x256xf32, #tpu.memory_space<vmem>>, vector<1x256xf32>
      %17 = vector.broadcast %16 : vector<1x256xf32> to vector<2x256xf32>
      %18 = arith.addf %15, %17 : vector<2x256xf32>
      %cst_17 = arith.constant 0.000000e+00 : f32
      %19 = vector.broadcast %cst_17 : f32 to vector<2x256xf32>
      %20 = arith.maximumf %18, %19 : vector<2x256xf32>
      %c0_18 = arith.constant 0 : index
      %c0_19 = arith.constant 0 : index
      %21 = vector.load %arg5[%c0_18, %c0_19] : memref<256x128xf32, #tpu.memory_space<vmem>>, vector<256x128xf32>
      %cst_20 = arith.constant dense<0.000000e+00> : vector<2x128xf32>
      %22 = tpu.matmul %20, %21, %cst_20 {dimension_numbers = #tpu.dot_dimension_numbers<[1], [0], [0], [1], [0, 0, 1, 1], [], []>} : vector<2x256xf32>, vector<256x128xf32>, vector<2x128xf32> -> vector<2x128xf32>
      %c0_21 = arith.constant 0 : index
      %c0_22 = arith.constant 0 : index
      %23 = vector.load %arg6[%c0_21, %c0_22] : memref<1x128xf32, #tpu.memory_space<vmem>>, vector<1x128xf32>
      %24 = vector.broadcast %23 : vector<1x128xf32> to vector<2x128xf32>
      %25 = arith.addf %22, %24 : vector<2x128xf32>
      %c0_23 = arith.constant 0 : index
      %c0_24 = arith.constant 0 : index
      %26 = vector.load %arg7[%c0_23, %c0_24] : memref<2x128xf32, #tpu.memory_space<vmem>>, vector<2x128xf32>
      tpu.vector_store %arg7[%c0_23, %c0_24], %25 {strides = array<i32>} : memref<2x128xf32, #tpu.memory_space<vmem>>, vector<2x128xf32>,
    } else {
    }
    return
  }
  func.func @transform_0(%arg0: i32, %arg1: i32) -> (i32, i32, i32) {
    %c0_i32 = arith.constant 0 : i32
    %c0_i32_0 = arith.constant 0 : i32
    return %arg0, %arg1, %c0_i32 : i32, i32, i32
  }
  func.func @transform_1(%arg0: i32, %arg1: i32) -> (i32, i32) {
    %c0_i32 = arith.constant 0 : i32
    %c0_i32_0 = arith.constant 0 : i32
    %c0_i32_1 = arith.constant 0 : i32
    return %c0_i32, %c0_i32_0 : i32, i32
  }
  func.func @transform_2(%arg0: i32, %arg1: i32) -> (i32, i32) {
    %c0_i32 = arith.constant 0 : i32
    %c0_i32_0 = arith.constant 0 : i32
    %c0_i32_1 = arith.constant 0 : i32
    return %c0_i32, %c0_i32_0 : i32, i32
  }
  func.func @transform_3(%arg0: i32, %arg1: i32) -> (i32, i32) {
    %c0_i32 = arith.constant 0 : i32
    %c0_i32_0 = arith.constant 0 : i32
    %c0_i32_1 = arith.constant 0 : i32
    return %c0_i32, %c0_i32_0 : i32, i32
  }
  func.func @transform_4(%arg0: i32, %arg1: i32) -> (i32, i32) {
    %c0_i32 = arith.constant 0 : i32
    %c0_i32_0 = arith.constant 0 : i32
    %c0_i32_1 = arith.constant 0 : i32
    return %c0_i32, %c0_i32_0 : i32, i32
  }
  func.func @transform_5(%arg0: i32, %arg1: i32) -> (i32, i32) {
    %c0_i32 = arith.constant 0 : i32
    %c0_i32_0 = arith.constant 0 : i32
    return %arg0, %c0_i32 : i32, i32
  }
}

</mosaic_0001>

<bundles_post_ra>
// kernel: tpu_custom_call.1
= control target key start
LH: loop header
LB: loop body
LE: loop exit
PB: predicated region body
PF: predicated region fallthrough
CT: control target
= control target key end

     0   :  { %10 = vsyncpa [#allocation4], 0  ;;  %s515_s0 = inlined_call_operand.hbm [shape: f32[2,8,32], index: 0, kind: input, shape index: {}]   ;;  %s516_s1 = inlined_call_operand.hbm [shape: f32[32,256], index: 1, kind: input, shape index: {}]   ;;  %s517_s2 = inlined_call_operand.vmem [shape: f32[1,256], index: 2, kind: input, shape index: {}]   ;;  %s518_s3 = inlined_call_operand.hbm [shape: f32[256,128], index: 3, kind: input, shape index: {}]   ;;  %s519_s4 = inlined_call_operand.vmem [shape: f32[1,128], index: 4, kind: input, shape index: {}]   ;;  %s520_s5 = inlined_call_operand.hbm [shape: f32[2,128], index: 5, kind: output, shape index: {}]  }
   0x1   :  { %11 = vsyncpa [#allocation7], 0 }
   0x2   :  { %12 = vsyncpa [#allocation5], 0  ;;  %s453_s18 = smov [#allocation6]  }
   0x3   :  { %s30_s19 = sshll.u32 %s453_s18, 4  ;;  %s31_s19 = int_to_ptr.vmem [resolvable:$true] %s30_s19 }
   0x4   :  { %s375_s20 = scalar_lea.vmem %s31_s19, 1024  ;;  %p380_p1 = scmp.lt.s32.totalorder %s31_s19, %s31_s19 }
   0x5   :  { %p376_p0 = scmp.ne.s32.totalorder %s31_s19, %s375_s20  ;;  %p381_p2 = scmp.lt.s32.totalorder %s375_s20, %s375_s20 }
   0x7   :  { %p382_p3 = por %p381_p2, %p380_p1 }
   0x9   :  { %p383_p4 = pnand %p382_p3, %p376_p0 }
   0xb   :  { %386 = shalt.err (!%p383_p4)
}
   0xc   :  { %s454_s21 = smov 256   ;;  %s455_s22 = smov 16  }
   0xd   :  { %36 = dma.hbm_to_vmem [thread:$0]  %s516_s1, 1024, %s31_s19, [#allocation7], %s454_s21, %s454_s21, %s455_s22  }
   0xe   :  { %s456_s25 = smov [#allocation3]  }
   0xf   :  { %s18_s26 = sshll.u32 %s456_s25, 4  ;;  %s19_s26 = int_to_ptr.vmem [resolvable:$true] %s18_s26 }
  0x10   :  { %s395_s27 = scalar_lea.vmem %s19_s26, 256  ;;  %p400_p6 = scmp.lt.s32.totalorder %s19_s26, %s19_s26 }
  0x11   :  { %p396_p5 = scmp.ne.s32.totalorder %s19_s26, %s395_s27  ;;  %p401_p7 = scmp.lt.s32.totalorder %s395_s27, %s395_s27 }
  0x13   :  { %p402_p8 = por %p401_p7, %p400_p6 }
  0x15   :  { %p403_p9 = pnand %p402_p8, %p396_p5 }
  0x17   :  { %406 = shalt.err (!%p403_p9)
}
  0x18   :  { %s457_s28 = smov 128   ;;  %s458_s29 = smov 8  }
  0x19   :  { %24 = dma.hbm_to_vmem [thread:$0]  %s515_s0, 256, %s19_s26, [#allocation4], %s457_s28, %s457_s28, %s458_s29  }
  0x1a   :  { %s459_s7 = smov [#allocation8]  }
  0x1b   :  { %s44_s8 = sshll.u32 %s459_s7, 4  ;;  %s45_s8 = int_to_ptr.vmem [resolvable:$true] %s44_s8 }
  0x1c   :  { %s415_s1 = scalar_lea.vmem %s45_s8, 4096  ;;  %p420_p11 = scmp.lt.s32.totalorder %s45_s8, %s45_s8 }
  0x1d   :  { %p416_p10 = scmp.ne.s32.totalorder %s45_s8, %s415_s1  ;;  %p421_p12 = scmp.lt.s32.totalorder %s415_s1, %s415_s1 }
  0x1f   :  { %p422_p13 = por %p421_p12, %p420_p11 }
  0x21   :  { %p423_p0 = pnand %p422_p13, %p416_p10 }
  0x23   :  { %426 = shalt.err (!%p423_p0)
}
  0x24   :  { %50 = dma.hbm_to_vmem [thread:$0]  %s518_s3, 4096, %s45_s8, [#allocation7], %s457_s28, %s457_s28, %s458_s29  }
  0x25   :  { %447 = dma.done.wait [#allocation4], 256  }
  0x26   :  { %448 = vsyncadd [#allocation4], 4294967040 }
  0x27   :  { %449 = dma.done.wait [#allocation7], 5120  }
  0x28   :  { %450 = vsyncadd [#allocation7], 4294962176  ;;  %vm66_vm0 = vcmask 254976   ;;  %v460_v0 = vmov 0.0   ;;  %v106_v1 = vld [vmem:[#allocation6 + $0x38] sm:$0xff]  ;;  %v105_v2 = vld [vmem:[#allocation6 + $0x30] sm:$0xff]  ;;  %v109_v62 = vlaneseq }
  0x29   :  { %67 = vst.msk [vmem:[#allocation2] sm:$0x3] %vm66_vm0, %v460_v0  ;;  %186 = vmatprep.mubr.f32.mxu0 %v460_v0  ;;  %v104_v3 = vld [vmem:[#allocation6 + $0x28] sm:$0xff]  ;;  %146 = vmatprep.subr.mxu0 %v106_v1  ;;  %v103_v4 = vld [vmem:[#allocation6 + $0x20] sm:$0xff]  ;;  %vm71_vm1 = vcmask 261120   ;;  %v102_v5 = vld [vmem:[#allocation6 + $0x18] sm:$0xff] }
  0x2a   :  { %147 = vmatpush1.msra.mxu0 %v105_v2  ;;  %v101_v6 = vld [vmem:[#allocation6 + $0x10] sm:$0xff]  ;;  %v100_v7 = vld [vmem:[#allocation6 + $0x8] sm:$0xff]  ;;  %v70_v9 = vld [vmem:[#allocation3 + $0x8] sm:$0xff]  ;;  %vm88_vm2 = vcmask 1041409   ;;  %v110_v63 = vshrl.u32 %v109_v62, 7  ;;  %s461_s13 = smov [#allocation9]  }
  0x2b   :  { %148 = vmatprep.subr.mxu0 %v104_v3  ;;  %v69_v8 = vld [vmem:[#allocation3] sm:$0xff]  ;;  %v226_v10 = vld [vmem:[#allocation8 + $0xf8] sm:$0xff]  ;;  %v79_v12 = vsel %vm71_vm1, %v70_v9, 0.0  ;;  %v99_v16 = vld [vmem:[#allocation6] sm:$0xff]  ;;  %s311_s14 = sshll.u32 %s461_s13, 4  ;;  %s312_s14 = int_to_ptr.vmem [resolvable:$true] %s311_s14 }
  0x2c   :  { %149 = vmatpush1.msra.mxu0 %v103_v4  ;;  %v72_v11 = vsel %vm71_vm1, %v69_v8, 0.0  ;;  %323 = vmatprep.subr.mxu1 %v226_v10  ;;  %v210_v13 = vld [vmem:[#allocation8 + $0x78] sm:$0xff]  ;;  %v225_v14 = vld [vmem:[#allocation8 + $0xf0] sm:$0xff]  ;;  %v80_v18 = vrot.slane %v79_v12, 4  ;;  %v224_v19 = vld [vmem:[#allocation8 + $0xe8] sm:$0xff]  ;;  %v111_v0 = vsub.s32 0, %v110_v63  ;;  %p432_p2 = scmp.lt.s32.totalorder %s312_s14, %s312_s14 }
  0x2d   :  { %v209_v15 = vld [vmem:[#allocation8 + $0x70] sm:$0xff]  ;;  %150 = vmatprep.subr.mxu0 %v102_v5  ;;  %v73_v17 = vrot.slane %v72_v11, 4  ;;  %324 = vmatpush3.msra.mxu1 %v210_v13  ;;  %v208_v20 = vld [vmem:[#allocation8 + $0x68] sm:$0xff]  ;;  %v223_v23 = vld [vmem:[#allocation8 + $0xe0] sm:$0xff]  ;;  %v115_v2 = vsub.s32 1, %v110_v63 }
  0x2e   :  { %151 = vmatpush1.msra.mxu0 %v101_v6  ;;  %325 = vmatprep.subr.mxu1 %v225_v14  ;;  %v81_v22 = vadd.f32 %v80_v18, %v79_v12  ;;  %v207_v24 = vld [vmem:[#allocation8 + $0x60] sm:$0xff]  ;;  %v222_v27 = vld [vmem:[#allocation8 + $0xd8] sm:$0xff]  ;;  %v221_v31 = vld [vmem:[#allocation8 + $0xd0] sm:$0xff] }
  0x2f   :  { %152 = vmatprep.subr.mxu0 %v100_v7  ;;  %v74_v21 = vadd.f32 %v73_v17, %v72_v11  ;;  %326 = vmatpush3.msra.mxu1 %v209_v15  ;;  %v206_v28 = vld [vmem:[#allocation8 + $0x58] sm:$0xff]  ;;  %v205_v32 = vld [vmem:[#allocation8 + $0x50] sm:$0xff]  ;;  %v220_v35 = vld [vmem:[#allocation8 + $0xc8] sm:$0xff] }
  0x30   :  { %153 = vmatpush1.msra.mxu0 %v99_v16  ;;  %327 = vmatprep.subr.mxu1 %v224_v19  ;;  %v82_v26 = vrot.slane %v81_v22, 2  ;;  %v204_v36 = vld [vmem:[#allocation8 + $0x48] sm:$0xff]  ;;  %v219_v40 = vld [vmem:[#allocation8 + $0xc0] sm:$0xff]  ;;  %v218_v43 = vld [vmem:[#allocation8 + $0xb8] sm:$0xff] }
  0x31   :  { %v75_v25 = vrot.slane %v74_v21, 2  ;;  %328 = vmatpush3.msra.mxu1 %v208_v20  ;;  %v68_v37 = vld [vmem:[#allocation2] sm:$0x3]  ;;  %v203_v41 = vld [vmem:[#allocation8 + $0x40] sm:$0xff]  ;;  %v202_v45 = vld [vmem:[#allocation8 + $0x38] sm:$0xff] }
  0x32   :  { %329 = vmatprep.subr.mxu1 %v223_v23  ;;  %v83_v30 = vadd.f32 %v82_v26, %v81_v22  ;;  %v217_v46 = vld [vmem:[#allocation8 + $0xb0] sm:$0xff]  ;;  %v216_v48 = vld [vmem:[#allocation8 + $0xa8] sm:$0xff]  ;;  %v215_v50 = vld [vmem:[#allocation8 + $0xa0] sm:$0xff] }
  0x33   :  { %v76_v29 = vadd.f32 %v75_v25, %v74_v21  ;;  %330 = vmatpush3.msra.mxu1 %v207_v24  ;;  %v201_v47 = vld [vmem:[#allocation8 + $0x30] sm:$0xff]  ;;  %v200_v49 = vld [vmem:[#allocation8 + $0x28] sm:$0xff]  ;;  %v199_v51 = vld [vmem:[#allocation8 + $0x20] sm:$0xff] }
  0x34   :  { %331 = vmatprep.subr.mxu1 %v222_v27  ;;  %v84_v34 = vrot.slane %v83_v30, 1  ;;  %v214_v54 = vld [vmem:[#allocation8 + $0x98] sm:$0xff]  ;;  %v213_v56 = vld [vmem:[#allocation8 + $0x90] sm:$0xff]  ;;  %v212_v58 = vld [vmem:[#allocation8 + $0x88] sm:$0xff] }
  0x35   :  { %v77_v33 = vrot.slane %v76_v29, 1  ;;  %332 = vmatpush3.msra.mxu1 %v206_v28  ;;  %v198_v55 = vld [vmem:[#allocation8 + $0x18] sm:$0xff]  ;;  %v197_v57 = vld [vmem:[#allocation8 + $0x10] sm:$0xff]  ;;  %v196_v59 = vld [vmem:[#allocation8 + $0x8] sm:$0xff] }
  0x36   :  { %333 = vmatprep.subr.mxu1 %v221_v31  ;;  %v85_v39 = vadd.f32 %v84_v34, %v83_v30  ;;  %v211_v60 = vld [vmem:[#allocation8 + $0x80] sm:$0xff]  ;;  %v107_v1 = vld [vmem:[%s517_s2] sm:$0x3]  ;;  %s427_s2 = scalar_lea.vmem %s312_s14, 32 }
  0x37   :  { %v78_v38 = vadd.f32 %v77_v33, %v76_v29  ;;  %334 = vmatpush3.msra.mxu1 %v205_v32  ;;  %v195_v61 = vld [vmem:[#allocation8] sm:$0xff]  ;;  %v112_v3 = vrot.slane %v107_v1, %v111_v0  ;;  %v116_v4 = vrot.slane %v107_v1, %v115_v2  ;;  %v322_v12 = vld [vmem:[%s519_s4] ss:$0 sm:$0xff]  ;;  %p428_p1 = scmp.ne.s32.totalorder %s312_s14, %s427_s2  ;;  %p433_p3 = scmp.lt.s32.totalorder %s427_s2, %s427_s2 }
  0x38   :  { %335 = vmatprep.subr.mxu1 %v220_v35 }
  0x39   :  { %v89_v42 = vsel %vm88_vm2, %v85_v39, %v78_v38  ;;  %336 = vmatpush3.msra.mxu1 %v204_v36  ;;  %p434_p4 = por %p433_p3, %p432_p2 }
  0x3a   :  { %v91_v44 = vadd.f32 %v89_v42, %v68_v37  ;;  %337 = vmatprep.subr.mxu1 %v219_v40 }
  0x3b   :  { %338 = vmatpush3.msra.mxu1 %v203_v41  ;;  %p435_p5 = pnand %p434_p4, %p428_p1 }
  0x3c   :  { %93 = vst.msk [vmem:[#allocation2] sm:$0x3] %vm66_vm0, %v91_v44  ;;  %339 = vmatprep.subr.mxu1 %v218_v43 }
  0x3d   :  { %340 = vmatpush3.msra.mxu1 %v202_v45 }
  0x3e   :  { %341 = vmatprep.subr.mxu1 %v217_v46 }
  0x3f   :  { %342 = vmatpush3.msra.mxu1 %v201_v47 }
  0x40   :  { %343 = vmatprep.subr.mxu1 %v216_v48 }
  0x41   :  { %344 = vmatpush3.msra.mxu1 %v200_v49 }
  0x42   :  { %345 = vmatprep.subr.mxu1 %v215_v50 }
  0x43   :  { %v97_v52 = vld [vmem:[#allocation2] sm:$0x3]  ;;  %346 = vmatpush3.msra.mxu1 %v199_v51 }
  0x44   :  { %v98_v53 = vmul.f32 0.125, %v97_v52  ;;  %347 = vmatprep.subr.mxu1 %v214_v54 }
  0x45   :  { %348 = vmatpush3.msra.mxu1 %v198_v55 }
  0x46   :  { %321 = vmatmul.mubr.msk.f32.vlgmr.msra.gmra.mxu0 %vm71_vm1, %v98_v53  ;;  %349 = vmatprep.subr.mxu1 %v213_v56 }
  0x47   :  { %350 = vmatpush3.msra.mxu1 %v197_v57 }
  0x48   :  { %351 = vmatprep.subr.mxu1 %v212_v58 }
  0x49   :  { %352 = vmatpush3.msra.mxu1 %v196_v59 }
  0x4a   :  { %353 = vmatprep.subr.mxu1 %v211_v60 }
  0x4b   :  { %354 = vmatpush3.msra.mxu1 %v195_v61 }
 0x106   :  { %v188_v5 = vpop.f32.mrf.mxu0 }
 0x107   :  { %v189_v6 = vadd.f32 %v188_v5, %v112_v3 }
 0x108   :  { %v190_v7 = vpop.f32.mrf.mxu0 }
 0x109   :  { %v191_v8 = vadd.f32 %v190_v7, %v116_v4  ;;  %v193_v10 = vmax.f32 %v189_v6, 0.0 }
 0x10b   :  { %v194_v9 = vmax.f32 %v191_v8, 0.0 }
 0x10d   :  { %298 = vmatprep.mubr.f32.mxu1 %v194_v9 }
 0x10e   :  { %299 = vmatmul.mubr.f32.vlgmr.msra.gmra.mxu1 %v193_v10 }
 0x1ce   :  { %v355_v11 = vpop.f32.mrf.mxu1 }
 0x1d0   :  { %v356_v13 = vpop.f32.mrf.mxu1 }
 0x1d1   :  { %v357_v14 = vadd.f32 %v356_v13, %v355_v11 }
 0x1d3   :  { %v301_v15 = vadd.f32 %v357_v14, %v322_v12 }
 0x1d5   :  { %304 = vst [vmem:[#allocation9] sm:$0x3] %v301_v15 }
 0x1d6   :  { %438 = shalt.err (!%p435_p5)
}
 0x1d7   :  { %314 = dma.vmem_to_hbm [thread:$0]  %s312_s14, 32, %s520_s5, [#allocation5]  }
 0x1d8   :  { %451 = dma.done.wait [#allocation5], 32  }
 0x1d9   :  { %452 = vsyncadd [#allocation5], 4294967264 }
 0x1da   :  { %318 = vsyncpa [#allocation4], 1 }
 0x1db   :  { %319 = vsyncpa [#allocation7], 1 }
 0x1dc   :  { %320 = vsyncpa [#allocation5], 1 }

</bundles_post_ra>
